<compile_context>
chip_gen: v5e
topology: v5e:2x2
jax: 0.10.0
libtpu: 0.0.40
codegen_flags: <defaults>
</compile_context>

<pallas_src>
import jax
import jax.numpy as jnp
from jax.experimental import pallas as pl
from jax.experimental.pallas import tpu as pltpu


def _round_up(x, m):
    return ((x + m - 1) // m) * m


def _sublane_align(dtype):
    # Sub-32-bit dtypes pack rows along sublanes: 8 for f32, 16 for bf16,
    # 32 for int8/fp8.
    return max(8, 32 // jnp.dtype(dtype).itemsize)


def _device_kind():
    try:
        return jax.devices()[0].device_kind.lower()
    except Exception:
        return ""


def _is_v5e(kind=None):
    kind = _device_kind() if kind is None else kind
    return ("v5e" in kind) or ("v5 lite" in kind) or ("v5litepod" in kind)


def _default_tiles():
    # v5e: ridge ~240 bf16 flops/byte -> 512x512 tiles already saturate the MXU.
    # v6e/v7x: ridge ~600-700 -> 1024x1024; tk scaled with tm/tn so the f32
    # accumulator read-modify-write stays well under MXU time per k-step.
    if _is_v5e():
        return 512, 512, 1024
    return 1024, 1024, 1024


def _vmem_limit_bytes():
    # Derive from physical VMEM (64 MiB/TC on v7x, 128 MiB on v5e/v6e) instead
    # of hardcoding; leave ~25% headroom for Mosaic internal scratch.
    try:
        cap = int(pltpu.get_tpu_info().vmem_capacity_bytes)
    except Exception:
        cap = 64 * 1024 * 1024
    return cap * 3 // 4


def _fit_tile(dim, tile, align):
    """Pick (effective_tile, padded_extent) for one dimension.

    Small dims use the full dimension as the block (allowed by the (8,128) rule,
    no host-side padding); large dims use a load-balanced, alignment-rounded
    tile so padding never exceeds ~one alignment unit per tile.
    """
    if dim <= tile:
        return dim, dim
    n_tiles = pl.cdiv(dim, tile)
    t = _round_up(pl.cdiv(dim, n_tiles), align)
    return t, _round_up(dim, t)


def _make_kernel(has_bias, use_acc_scratch):
    if use_acc_scratch:
        # Low-precision output: keep an f32 VMEM accumulator, cast at finalize.
        def kernel(*refs):
            if has_bias:
                x_ref, w_ref, b_ref, o_ref, acc_ref = refs
            else:
                x_ref, w_ref, o_ref, acc_ref = refs
            k = pl.program_id(2)

            @pl.when(k == 0)
            def _():
                acc_ref[...] = jnp.zeros_like(acc_ref)

            acc_ref[...] += jnp.dot(x_ref[...], w_ref[...],
                                    preferred_element_type=jnp.float32)

            @pl.when(k == pl.num_programs(2) - 1)
            def _():
                res = acc_ref[...]
                if has_bias:
                    res = res + b_ref[...]
                o_ref[...] = res.astype(o_ref.dtype)
    else:
        # f32 output: accumulate directly into the resident output block
        # (saves tm*tn*4 bytes of VMEM and the finalize copy/cast).
        def kernel(*refs):
            if has_bias:
                x_ref, w_ref, b_ref, o_ref = refs
            else:
                x_ref, w_ref, o_ref = refs
            k = pl.program_id(2)

            @pl.when(k == 0)
            def _():
                if has_bias:
                    o_ref[...] = jnp.broadcast_to(b_ref[...], o_ref.shape)
                else:
                    o_ref[...] = jnp.zeros_like(o_ref)

            o_ref[...] += jnp.dot(x_ref[...], w_ref[...],
                                  preferred_element_type=jnp.float32)

    return kernel


def _tiled_column_linear(x2d, w_t, bias_f32, *, tm, tn, tk, out_dtype):
    """x2d: [M, K] (compute dtype), w_t: [K, N] (compute dtype, pre-transposed),
    bias_f32: [1, N] f32 or None.  Returns [M, N] in out_dtype."""
    M, K = x2d.shape
    K2, N = w_t.shape
    assert K2 == K

    m_align = _sublane_align(x2d.dtype)          # 8 f32 / 16 bf16 / 32 int8
    tm_e, M_pad = _fit_tile(M, tm, m_align)
    tn_e, N_pad = _fit_tile(N, tn, 128)
    tk_e, K_pad = _fit_tile(K, tk, 128)

    # Pad only when a dim is ragged vs its tile (common large shapes skip this).
    # K must be zero-padded: garbage in the K tail would corrupt the accumulator.
    x_p = x2d
    if (M_pad, K_pad) != (M, K):
        x_p = jnp.pad(x2d, ((0, M_pad - M), (0, K_pad - K)))
    w_p = w_t
    if (K_pad, N_pad) != (K, N):
        w_p = jnp.pad(w_t, ((0, K_pad - K), (0, N_pad - N)))

    grid = (M_pad // tm_e, N_pad // tn_e, K_pad // tk_e)

    has_bias = bias_f32 is not None
    use_acc_scratch = jnp.dtype(out_dtype) != jnp.dtype(jnp.float32)

    x_item = jnp.dtype(x2d.dtype).itemsize
    w_item = jnp.dtype(w_t.dtype).itemsize
    o_item = jnp.dtype(out_dtype).itemsize
    cost = pl.CostEstimate(
        flops=2 * M_pad * N_pad * K_pad,
        transcendentals=0,
        bytes_accessed=(M_pad * K_pad * x_item * grid[1]     # x re-read per N tile
                        + K_pad * N_pad * w_item * grid[0]   # w re-read per M tile
                        + M_pad * N_pad * o_item),
    )
    cparams = pltpu.CompilerParams(
        dimension_semantics=("parallel", "parallel", "arbitrary"),
        vmem_limit_bytes=_vmem_limit_bytes(),
    )

    # Deeper input buffering on v5e hides its slower HBM behind the weaker MXU.
    bs_kwargs = {}
    if _is_v5e():
        bs_kwargs["pipeline_mode"] = pl.Buffered(3)
    x_spec = pl.BlockSpec((tm_e, tk_e), lambda i, j, k: (i, k), **bs_kwargs)
    w_spec = pl.BlockSpec((tk_e, tn_e), lambda i, j, k: (k, j), **bs_kwargs)
    o_spec = pl.BlockSpec((tm_e, tn_e), lambda i, j, k: (i, j))

    in_specs = [x_spec, w_spec]
    operands = [x_p, w_p]
    if has_bias:
        b_p = bias_f32
        if N_pad != N:
            b_p = jnp.pad(b_p, ((0, 0), (0, N_pad - N)))
        in_specs.append(pl.BlockSpec((1, tn_e), lambda i, j, k: (0, j)))
        operands.append(b_p)

    scratch = [pltpu.VMEM((tm_e, tn_e), jnp.float32)] if use_acc_scratch else []

    out_p = pl.pallas_call(
        _make_kernel(has_bias, use_acc_scratch),
        out_shape=jax.ShapeDtypeStruct((M_pad, N_pad), out_dtype),
        grid_spec=pltpu.PrefetchScalarGridSpec(
            num_scalar_prefetch=0,
            grid=grid,
            in_specs=in_specs,
            out_specs=o_spec,
            scratch_shapes=scratch,
        ),
        compiler_params=cparams,
        cost_estimate=cost,
    )(*operands)

    if (M_pad, N_pad) != (M, N):
        out_p = out_p[:M, :N]
    return out_p


def mc2_column_parallel_linear_forward(input_shards, weight, bias, *,
                                       skip_bias_add=False,
                                       compute_dtype=None,
                                       tm=None, tn=None, tk=None):
    """MC2 column-parallel (sequence-parallel) linear forward.

    input_shards: [W, S_local, B, H]  (W = simulated TP world size)
    weight:       [N_part, H]
    bias:         [N_part] or None
    Returns (output [S_total, B, N_part], output_bias).
    """
    W, S_local, B, H = input_shards.shape
    N = weight.shape[0]
    out_dtype = input_shards.dtype

    d_tm, d_tn, d_tk = _default_tiles()
    tm = d_tm if tm is None else tm
    tn = d_tn if tn is None else tn
    tk = d_tk if tk is None else tk

    # Simulated sequence-parallel all_gather over the TP group (concat on seq axis).
    # TODO(synk): replace with a fused ring all-gather + per-shard matmul
    #             (make_async_remote_copy + collective_id) on real multi-chip.
    gathered = input_shards.reshape(W * S_local, B, H)
    S_total = W * S_local
    x2d = gathered.reshape(S_total * B, H)

    # bf16 operands by default on every generation (MXU-native, halves the HBM
    # stream); accumulation stays f32 inside the kernel.
    if compute_dtype is None:
        compute_dtype = (jnp.bfloat16
                         if jnp.dtype(out_dtype) in (jnp.dtype(jnp.float32),
                                                     jnp.dtype(jnp.bfloat16))
                         else out_dtype)
    x2d = x2d.astype(compute_dtype)
    # Pre-transpose the weight once to [K, N]: the MXU consumes [K, N] directly,
    # avoiding a per-k-step XLU transpose of the weight tile.  For a parameter
    # this is amortized over the run.
    w_t = weight.astype(compute_dtype).T

    add_bias = (bias is not None) and (not skip_bias_add)
    bias_f32 = bias.astype(jnp.float32).reshape(1, N) if add_bias else None

    out2d = _tiled_column_linear(x2d, w_t, bias_f32, tm=tm, tn=tn, tk=tk,
                                 out_dtype=out_dtype)
    output = out2d.reshape(S_total, B, N)
    output_bias = bias if skip_bias_add else None
    return output, output_bias


if __name__ == "__main__":
    key = jax.random.PRNGKey(0)
    k_x, k_w = jax.random.split(key)

    # Small, module-consistent shapes.
    world_size = 2            # simulated tensor-parallel group size
    S_local, B = 8, 2         # per-rank sequence shard, batch
    input_size = 256          # H_in
    output_size = 256         # full output; per-partition = 128
    n_part = output_size // world_size

    input_shards = jax.random.normal(
        k_x, (world_size, S_local, B, input_size), dtype=jnp.float32)
    weight = (jax.random.normal(
        k_w, (n_part, input_size), dtype=jnp.float32) * 0.02)
    bias = jnp.zeros((n_part,), dtype=jnp.float32) + 0.1

    gathered = input_shards.reshape(world_size * S_local, B, input_size)

    # Path 1: default (bf16 operands, f32 accumulation), bias fused in-kernel.
    output, output_bias = mc2_column_parallel_linear_forward(
        input_shards, weight, bias, skip_bias_add=False)
    output = jax.block_until_ready(output)
    ref_bf16 = jnp.einsum(
        "sbh,nh->sbn",
        gathered.astype(jnp.bfloat16), weight.astype(jnp.bfloat16),
        preferred_element_type=jnp.float32) + bias
    assert output.shape == (world_size * S_local, B, n_part)
    assert output_bias is None
    assert jnp.allclose(output, ref_bf16, atol=1e-3, rtol=1e-3)

    # Path 2: skip_bias_add + explicit small tiles to exercise the tiled
    # (i, j, k) grid with k-accumulation into the resident f32 output block.
    output2, output_bias2 = mc2_column_parallel_linear_forward(
        input_shards, weight, bias, skip_bias_add=True,
        tm=16, tn=128, tk=128)
    output2 = jax.block_until_ready(output2)
    ref2_bf16 = jnp.einsum(
        "sbh,nh->sbn",
        gathered.astype(jnp.bfloat16), weight.astype(jnp.bfloat16),
        preferred_element_type=jnp.float32)
    assert jnp.allclose(output2, ref2_bf16, atol=1e-3, rtol=1e-3)
    assert output_bias2 is bias

    # Path 3: explicit f32 operands (exact reference), tiled grid.
    output3, _ = mc2_column_parallel_linear_forward(
        input_shards, weight, bias, skip_bias_add=False,
        compute_dtype=jnp.float32, tm=16, tn=128, tk=128)
    output3 = jax.block_until_ready(output3)
    ref3 = jnp.einsum("sbh,nh->sbn", gathered, weight) + bias
    assert jnp.allclose(output3, ref3, atol=1e-5, rtol=1e-5)

    print("KERNEL_OK")
</pallas_src>

<mosaic_0001>
module attributes {stable_mosaic.version = 11 : i64} {
  func.func @kernel(%arg0: i32, %arg1: i32, %arg2: i32, %arg3: memref<32x256xbf16, #tpu.memory_space<vmem>>, %arg4: memref<256x128xbf16, #tpu.memory_space<vmem>>, %arg5: memref<1x128xf32, #tpu.memory_space<vmem>>, %arg6: memref<32x128xf32, #tpu.memory_space<vmem>>) attributes {dimension_semantics = [#tpu.dimension_semantics<parallel>, #tpu.dimension_semantics<parallel>, #tpu.dimension_semantics<arbitrary>], iteration_bounds = array<i64: 1, 1, 1>, scalar_prefetch = 0 : i64, scratch_operands = 0 : i64, tpu.core_type = #tpu.core_type<tc>, window_params = [{transform_indices = @transform_0, window_bounds = array<i64: 32, 256>}, {transform_indices = @transform_1, window_bounds = array<i64: 256, 128>}, {transform_indices = @transform_2, window_bounds = array<i64: 1, 128>}, {transform_indices = @transform_3, window_bounds = array<i64: 32, 128>}]} {
    %c0_i32 = arith.constant 0 : i32
    %0 = arith.cmpi eq, %arg2, %c0_i32 : i32
    %1 = arith.extui %0 : i1 to i32
    %c0_i32_0 = arith.constant 0 : i32
    %2 = arith.cmpi ne, %1, %c0_i32_0 : i32
    scf.if %2 {
      %c0_8 = arith.constant 0 : index
      %c0_9 = arith.constant 0 : index
      %9 = vector.load %arg5[%c0_8, %c0_9] : memref<1x128xf32, #tpu.memory_space<vmem>>, vector<1x128xf32>
      %10 = vector.shape_cast %9 : vector<1x128xf32> to vector<1x128xf32>
      %11 = vector.broadcast %10 : vector<1x128xf32> to vector<32x128xf32>
      %c0_10 = arith.constant 0 : index
      %c0_11 = arith.constant 0 : index
      %12 = vector.load %arg6[%c0_10, %c0_11] : memref<32x128xf32, #tpu.memory_space<vmem>>, vector<32x128xf32>
      tpu.vector_store %arg6[%c0_10, %c0_11], %11 {strides = array<i32>} : memref<32x128xf32, #tpu.memory_space<vmem>>, vector<32x128xf32>,
    } else {
    }
    %c0 = arith.constant 0 : index
    %c0_1 = arith.constant 0 : index
    %3 = vector.load %arg6[%c0, %c0_1] : memref<32x128xf32, #tpu.memory_space<vmem>>, vector<32x128xf32>
    %c0_2 = arith.constant 0 : index
    %c0_3 = arith.constant 0 : index
    %4 = vector.load %arg3[%c0_2, %c0_3] : memref<32x256xbf16, #tpu.memory_space<vmem>>, vector<32x256xbf16>
    %c0_4 = arith.constant 0 : index
    %c0_5 = arith.constant 0 : index
    %5 = vector.load %arg4[%c0_4, %c0_5] : memref<256x128xbf16, #tpu.memory_space<vmem>>, vector<256x128xbf16>
    %cst = arith.constant dense<0.000000e+00> : vector<32x128xf32>
    %6 = tpu.matmul %4, %5, %cst {dimension_numbers = #tpu.dot_dimension_numbers<[1], [0], [0], [1], [0, 0, 1, 1], [], []>} : vector<32x256xbf16>, vector<256x128xbf16>, vector<32x128xf32> -> vector<32x128xf32>
    %7 = arith.addf %3, %6 : vector<32x128xf32>
    %c0_6 = arith.constant 0 : index
    %c0_7 = arith.constant 0 : index
    %8 = vector.load %arg6[%c0_6, %c0_7] : memref<32x128xf32, #tpu.memory_space<vmem>>, vector<32x128xf32>
    tpu.vector_store %arg6[%c0_6, %c0_7], %7 {strides = array<i32>} : memref<32x128xf32, #tpu.memory_space<vmem>>, vector<32x128xf32>,
    return
  }
  func.func @transform_0(%arg0: i32, %arg1: i32, %arg2: i32) -> (i32, i32) {
    %c0_i32 = arith.constant 0 : i32
    return %arg0, %arg2 : i32, i32
  }
  func.func @transform_1(%arg0: i32, %arg1: i32, %arg2: i32) -> (i32, i32) {
    %c0_i32 = arith.constant 0 : i32
    return %arg2, %arg1 : i32, i32
  }
  func.func @transform_2(%arg0: i32, %arg1: i32, %arg2: i32) -> (i32, i32) {
    %c0_i32 = arith.constant 0 : i32
    %c0_i32_0 = arith.constant 0 : i32
    return %c0_i32, %arg1 : i32, i32
  }
  func.func @transform_3(%arg0: i32, %arg1: i32, %arg2: i32) -> (i32, i32) {
    %c0_i32 = arith.constant 0 : i32
    return %arg0, %arg1 : i32, i32
  }
}

</mosaic_0001>

<bundles_post_ra>
// kernel: tpu_custom_call.1
= control target key start
LH: loop header
LB: loop body
LE: loop exit
PB: predicated region body
PF: predicated region fallthrough
CT: control target
= control target key end

     0   :  { %8 = vsyncpa [#allocation3], 0  ;;  %s528_s0 = inlined_call_operand.hbm [shape: bf16[32,256], index: 0, kind: input, shape index: {}]   ;;  %s529_s1 = inlined_call_operand.hbm [shape: bf16[256,128], index: 1, kind: input, shape index: {}]   ;;  %s530_s2 = inlined_call_operand.vmem [shape: f32[1,128], index: 2, kind: input, shape index: {}]   ;;  %s531_s3 = inlined_call_operand.hbm [shape: f32[32,128], index: 3, kind: output, shape index: {}]  }
   0x1   :  { %9 = vsyncpa [#allocation6], 0 }
   0x2   :  { %10 = vsyncpa [#allocation4], 0  ;;  %s15_s14 = sshll.u32 %s528_s0, 4  ;;  %s483_s15 = smov [#allocation2]   ;;  %s16_s14 = int_to_ptr.hbm [resolvable:$true] %s15_s14 }
   0x3   :  { %s17_s16 = sshll.u32 %s483_s15, 4  ;;  %s28_s19 = sshll.u32 %s529_s1, 4  ;;  %s18_s16 = int_to_ptr.vmem [resolvable:$true] %s17_s16  ;;  %s29_s19 = int_to_ptr.hbm [resolvable:$true] %s28_s19 }
   0x4   :  { %s484_s20 = smov 128   ;;  %s485_s21 = smov 8  }
   0x5   :  { %23 = dma.hbm_to_vmem [thread:$0]  %s16_s14, 512, %s18_s16, [#allocation3], %s484_s20, %s484_s20, %s485_s21  }
   0x6   :  { %s486_s22 = smov [#allocation5]   ;;  %s487_s24 = smov 64  }
   0x7   :  { %s30_s23 = sshll.u32 %s486_s22, 4  ;;  %s488_s0 = smov 4   ;;  %s31_s23 = int_to_ptr.vmem [resolvable:$true] %s30_s23 }
   0x8   :  { %36 = dma.hbm_to_vmem [thread:$0]  %s29_s19, 2048, %s31_s23, [#allocation6], %s487_s24, %s487_s24, %s488_s0  }
   0x9   :  { %477 = dma.done.wait [#allocation3], 512  }
   0xa   :  { %478 = vsyncadd [#allocation3], 4294966784 }
   0xb   :  { %479 = dma.done.wait [#allocation6], 2048  }
   0xc   :  { %480 = vsyncadd [#allocation6], 4294965248  ;;  %v372_v0 = vld [vmem:[#allocation5 + $0x38] sm:$0xff]  ;;  %v371_v2 = vld [vmem:[#allocation5 + $0x30] sm:$0xff]  ;;  %s489_s26 = smov [#allocation7]   ;;  %s267_s29 = sshll.u32 %s531_s3, 4  ;;  %s268_s29 = int_to_ptr.hbm [resolvable:$true] %s267_s29 }
   0xd   :  { %v380_v1 = vld [vmem:[#allocation5 + $0x78] sm:$0xff]  ;;  %215 = vmatpush.bf16.msra.mxu0 %v372_v0  ;;  %381 = vmatpush.bf16.msra.mxu2 %v372_v0  ;;  %v379_v3 = vld [vmem:[#allocation5 + $0x70] sm:$0xff]  ;;  %v370_v4 = vld [vmem:[#allocation5 + $0x28] sm:$0xff]  ;;  %s265_s27 = sshll.u32 %s489_s26, 4  ;;  %s266_s27 = int_to_ptr.vmem [resolvable:$true] %s265_s27 }
   0xe   :  { %234 = vmatpush.bf16.msra.mxu1 %v380_v1  ;;  %389 = vmatpush.bf16.msra.mxu3 %v380_v1  ;;  %v378_v5 = vld [vmem:[#allocation5 + $0x68] sm:$0xff]  ;;  %v369_v6 = vld [vmem:[#allocation5 + $0x20] sm:$0xff]  ;;  %v368_v8 = vld [vmem:[#allocation5 + $0x18] sm:$0xff] }
   0xf   :  { %v377_v7 = vld [vmem:[#allocation5 + $0x60] sm:$0xff]  ;;  %v376_v9 = vld [vmem:[#allocation5 + $0x58] sm:$0xff]  ;;  %v367_v10 = vld [vmem:[#allocation5 + $0x10] sm:$0xff] }
  0x10   :  { %v375_v11 = vld [vmem:[#allocation5 + $0x50] sm:$0xff]  ;;  %v366_v12 = vld [vmem:[#allocation5 + $0x8] sm:$0xff]  ;;  %v365_v14 = vld [vmem:[#allocation5] sm:$0xff] }
  0x11   :  { %216 = vmatpush.bf16.msra.mxu0 %v371_v2  ;;  %382 = vmatpush.bf16.msra.mxu2 %v371_v2  ;;  %v374_v13 = vld [vmem:[#allocation5 + $0x48] sm:$0xff]  ;;  %v373_v15 = vld [vmem:[#allocation5 + $0x40] sm:$0xff]  ;;  %v291_v18 = vld [vmem:[#allocation2 + $0x10] sm:$0xf] }
  0x12   :  { %235 = vmatpush.bf16.msra.mxu1 %v379_v3  ;;  %390 = vmatpush.bf16.msra.mxu3 %v379_v3  ;;  %v283_v16 = vld [vmem:[#allocation2] sm:$0xf]  ;;  %v362_v17 = vld [vmem:[#allocation2 + $0x4] sm:$0xf0]  ;;  %v364_v19 = vld [vmem:[#allocation2 + $0x14] sm:$0xf0] }
  0x13   :  { %v361_v20 = vld [vmem:[#allocation2 + $0x4] sm:$0xf]  ;;  %v285_v21 = vld [vmem:[#allocation2 + $0x8] sm:$0xf0]  ;;  %v363_v22 = vld [vmem:[#allocation2 + $0x14] sm:$0xf]  ;;  %v284_v24 = vor.u32 %v362_v17, %v283_v16  ;;  %v292_v25 = vor.u32 %v364_v19, %v291_v18 }
  0x14   :  { %v293_v23 = vld [vmem:[#allocation2 + $0x18] sm:$0xf0]  ;;  %v288_v26 = vor.u32 %v361_v20, %v285_v21  ;;  %v404_v29 = vld [vmem:[%s530_s2] ss:$0 sm:$0xff] }
  0x15   :  { %217 = vmatpush.bf16.msra.mxu0 %v370_v4  ;;  %383 = vmatpush.bf16.msra.mxu2 %v370_v4  ;;  %v296_v27 = vor.u32 %v363_v22, %v293_v23 }
  0x16   :  { %236 = vmatpush.bf16.msra.mxu1 %v378_v5  ;;  %391 = vmatpush.bf16.msra.mxu3 %v378_v5 }
  0x19   :  { %218 = vmatpush.bf16.msra.mxu0 %v369_v6  ;;  %384 = vmatpush.bf16.msra.mxu2 %v369_v6 }
  0x1a   :  { %237 = vmatpush.bf16.msra.mxu1 %v377_v7  ;;  %392 = vmatpush.bf16.msra.mxu3 %v377_v7 }
  0x1d   :  { %219 = vmatpush.bf16.msra.mxu0 %v368_v8  ;;  %385 = vmatpush.bf16.msra.mxu2 %v368_v8 }
  0x1e   :  { %238 = vmatpush.bf16.msra.mxu1 %v376_v9  ;;  %393 = vmatpush.bf16.msra.mxu3 %v376_v9 }
  0x21   :  { %220 = vmatpush.bf16.msra.mxu0 %v367_v10  ;;  %386 = vmatpush.bf16.msra.mxu2 %v367_v10 }
  0x22   :  { %239 = vmatpush.bf16.msra.mxu1 %v375_v11  ;;  %394 = vmatpush.bf16.msra.mxu3 %v375_v11 }
  0x25   :  { %221 = vmatpush.bf16.msra.mxu0 %v366_v12  ;;  %387 = vmatpush.bf16.msra.mxu2 %v366_v12 }
  0x26   :  { %240 = vmatpush.bf16.msra.mxu1 %v374_v13  ;;  %395 = vmatpush.bf16.msra.mxu3 %v374_v13 }
  0x29   :  { %222 = vmatpush.bf16.msra.mxu0 %v365_v14  ;;  %388 = vmatpush.bf16.msra.mxu2 %v365_v14 }
  0x2a   :  { %241 = vmatpush.bf16.msra.mxu1 %v373_v15  ;;  %396 = vmatpush.bf16.msra.mxu3 %v373_v15 }
  0x2c   :  { %223 = vmatmul.bf16.vlgmr.msra.gmra.mxu0 %v284_v24  ;;  %228 = vmatmul.bf16.vlgmr.msra.gmra.mxu2 %v292_v25 }
  0x2d   :  { %242 = vmatmul.bf16.vlgmr.msra.gmra.mxu1 %v288_v26  ;;  %247 = vmatmul.bf16.vlgmr.msra.gmra.mxu3 %v296_v27 }
  0xa9   :  { %v224_v28 = vpop.f32.mrf.mxu0 }
  0xaa   :  { %v243_v30 = vpop.f32.mrf.mxu1 }
  0xab   :  { %v244_v31 = vadd.f32 %v243_v30, %v224_v28 }
  0xad   :  { %v253_v32 = vadd.f32 %v404_v29, %v244_v31 }
  0xaf   :  { %257 = vst [vmem:[#allocation7] sm:$0xff] %v253_v32  ;;  %v229_v33 = vpop.f32.mrf.mxu2 }
  0xb0   :  { %v248_v34 = vpop.f32.mrf.mxu3 }
  0xb1   :  { %v249_v35 = vadd.f32 %v248_v34, %v229_v33  ;;  %v226_v36 = vpop.f32.mrf.mxu0 }
  0xb2   :  { %v245_v37 = vpop.f32.mrf.mxu1 }
  0xb3   :  { %v255_v38 = vadd.f32 %v404_v29, %v249_v35  ;;  %v246_v39 = vadd.f32 %v245_v37, %v226_v36 }
  0xb5   :  { %259 = vst [vmem:[#allocation7 + $0x10] sm:$0xff] %v255_v38  ;;  %v254_v40 = vadd.f32 %v404_v29, %v246_v39 }
  0xb7   :  { %258 = vst [vmem:[#allocation7 + $0x8] sm:$0xff] %v254_v40  ;;  %v231_v41 = vpop.f32.mrf.mxu2 }
  0xb8   :  { %v250_v42 = vpop.f32.mrf.mxu3 }
  0xb9   :  { %v251_v43 = vadd.f32 %v250_v42, %v231_v41 }
  0xbb   :  { %v256_v44 = vadd.f32 %v404_v29, %v251_v43 }
  0xbd   :  { %260 = vst [vmem:[#allocation7 + $0x18] sm:$0xff] %v256_v44 }
  0xbe   :  { %273 = dma.vmem_to_hbm [thread:$0]  %s266_s27, 512, %s268_s29, [#allocation4], %s484_s20, %s484_s20, %s485_s21  }
  0xbf   :  { %481 = dma.done.wait [#allocation4], 512  }
  0xc0   :  { %482 = vsyncadd [#allocation4], 4294966784 }
  0xc1   :  { %278 = vsyncpa [#allocation3], 1 }
  0xc2   :  { %279 = vsyncpa [#allocation6], 1 }
  0xc3   :  { %280 = vsyncpa [#allocation4], 1 }

</bundles_post_ra>
